<compile_context>
chip_gen: v7x
topology: tpu7x:2x2x1
jax: 0.10.0
libtpu: 0.0.40
codegen_flags: <defaults>
</compile_context>

<pallas_src>
import functools

import jax
import jax.numpy as jnp
from jax import lax
from jax.experimental import pallas as pl
from jax.experimental.pallas import tpu as pltpu

N_INPUTS = 784
HIDDEN = 128
N_OUTPUTS = 10

K_PAD = 896      # 7 * 128: lane-aligned contraction dim for layer 1
OUT_PAD = 128    # lane-dense logits width (sliced back to 10 in the wrapper)


def _round_up(n: int, m: int) -> int:
    return ((n + m - 1) // m) * m


def mlp_forward_kernel(x_ref,
                       w1_ref, b1_ref,
                       w2_ref, b2_ref,
                       w3_ref, b3_ref,
                       w4_ref, b4_ref,
                       out_ref,
                       *, mask_window=None):
    """One batch tile: 4 MXU matmuls + VPU bias/ReLU, fully lane-dense."""
    cdt = w1_ref.dtype  # compute dtype of activations fed to the MXU (f32 or bf16)

    h = jnp.dot(x_ref[...], w1_ref[...], preferred_element_type=jnp.float32)
    h = jnp.maximum(h + b1_ref[...], 0.0)
    h = jnp.dot(h.astype(cdt), w2_ref[...], preferred_element_type=jnp.float32)
    h = jnp.maximum(h + b2_ref[...], 0.0)
    h = jnp.dot(h.astype(cdt), w3_ref[...], preferred_element_type=jnp.float32)
    h = jnp.maximum(h + b3_ref[...], 0.0)
    logits = jnp.dot(h.astype(cdt), w4_ref[...],
                     preferred_element_type=jnp.float32) + b4_ref[...]

    # CIFAR-style task-offset masking. Only emitted when the offsets are
    # non-trivial (static Python ints); the MLP path skips this entirely.
    if mask_window is not None:
        off1, off2 = mask_window
        col = lax.broadcasted_iota(jnp.int32, logits.shape, 1)
        keep = (col >= off1) & (col < off2)
        logits = jnp.where(keep, logits, jnp.float32(-1e11))

    out_ref[...] = logits


def net_forward(x, params, offset1=0, offset2=N_OUTPUTS, *,
                block_batch=256, use_bf16=False):
    """Pallas forward. x: (B, 784) f32. Returns (B, 10) f32 logits."""
    (w1, b1), (w2, b2), (w3, b3), (w4, b4) = params
    B = x.shape[0]

    # --- one-time wrapper-side padding (lane-dense K and lane-dense output) ---
    x_p = jnp.pad(x, ((0, 0), (0, K_PAD - N_INPUTS)))
    w1_p = jnp.pad(w1, ((0, K_PAD - N_INPUTS), (0, 0)))
    w4_p = jnp.pad(w4, ((0, 0), (0, OUT_PAD - N_OUTPUTS)))
    b4_p = jnp.pad(b4, ((0, 0), (0, OUT_PAD - N_OUTPUTS)))

    if use_bf16:
        # bf16 MXU feed (v6e/v7x); biases / accumulation stay f32.
        x_p, w1_p, w2c, w3c, w4c = (a.astype(jnp.bfloat16)
                                    for a in (x_p, w1_p, w2, w3, w4_p))
    else:
        w2c, w3c, w4c = w2, w3, w4_p

    # --- batch tiling: sublane-aligned tile, padded batch, pipelined grid ---
    TB = min(block_batch, _round_up(max(B, 1), 8))
    TB = _round_up(TB, 8)
    B_pad = _round_up(max(B, 1), TB)
    if B_pad != B:
        x_p = jnp.pad(x_p, ((0, B_pad - B), (0, 0)))
    grid = (B_pad // TB,)

    # Specialize the mask away for the MLP (non-CIFAR) path.
    mask_window = None
    if not (offset1 == 0 and offset2 >= N_OUTPUTS):
        mask_window = (int(offset1), int(offset2))
    kernel = functools.partial(mlp_forward_kernel, mask_window=mask_window)

    resident = lambda shape: pl.BlockSpec(shape, lambda i: (0, 0))

    grid_spec = pltpu.PrefetchScalarGridSpec(
        num_scalar_prefetch=0,
        grid=grid,
        in_specs=[
            pl.BlockSpec((TB, K_PAD), lambda i: (i, 0)),      # x tile (pipelined)
            resident(w1_p.shape), resident(b1.shape),         # weights stay in VMEM
            resident(w2c.shape), resident(b2.shape),
            resident(w3c.shape), resident(b3.shape),
            resident(w4c.shape), resident(b4_p.shape),
        ],
        out_specs=pl.BlockSpec((TB, OUT_PAD), lambda i: (i, 0)),
    )

    out = pl.pallas_call(
        kernel,
        out_shape=jax.ShapeDtypeStruct((B_pad, OUT_PAD), jnp.float32),
        grid_spec=grid_spec,
        compiler_params=pltpu.CompilerParams(
            dimension_semantics=("parallel",)),  # batch tiles are independent
    )(x_p, w1_p, b1, w2c, b2, w3c, b3, w4c, b4_p)

    # Drop batch padding and the lane-padded logit columns.
    return out[:B, :N_OUTPUTS]


def init_params(key):
    """Deterministic init of MLP([784, 128, 128, 128, 10]) parameters."""
    sizes = [N_INPUTS, HIDDEN, HIDDEN, HIDDEN, N_OUTPUTS]
    params = []
    for fan_in, fan_out in zip(sizes[:-1], sizes[1:]):
        key, kw, kb = jax.random.split(key, 3)
        bound = 1.0 / jnp.sqrt(fan_in)
        w = jax.random.uniform(kw, (fan_in, fan_out), jnp.float32, -bound, bound)
        b = jax.random.uniform(kb, (1, fan_out), jnp.float32, -bound, bound)
        params.append((w, b))
    return params


if __name__ == "__main__":
    key = jax.random.PRNGKey(0)
    key, kx = jax.random.split(key)
    batch = 2
    x = jax.random.normal(kx, (batch, N_INPUTS), dtype=jnp.float32)

    params = init_params(key)

    # Non-CIFAR path: offsets (0, n_outputs) -> mask specialized away.
    out = net_forward(x, params, offset1=0, offset2=N_OUTPUTS)
    out = jax.block_until_ready(out)

    # Plain-JAX reference of the same MLP.
    (w1, b1), (w2, b2), (w3, b3), (w4, b4) = params
    h = jnp.maximum(x @ w1 + b1, 0.0)
    h = jnp.maximum(h @ w2 + b2, 0.0)
    h = jnp.maximum(h @ w3 + b3, 0.0)
    ref = h @ w4 + b4

    assert out.shape == (batch, N_OUTPUTS)
    assert jnp.allclose(out, ref, atol=1e-4, rtol=1e-4)

    print("KERNEL_OK")
</pallas_src>

<mosaic_0001>
module attributes {stable_mosaic.version = 11 : i64} {
  func.func @mlp_forward_kernel(%arg0: i32, %arg1: memref<8x896xf32, #tpu.memory_space<vmem>>, %arg2: memref<896x128xf32, #tpu.memory_space<vmem>>, %arg3: memref<1x128xf32, #tpu.memory_space<vmem>>, %arg4: memref<128x128xf32, #tpu.memory_space<vmem>>, %arg5: memref<1x128xf32, #tpu.memory_space<vmem>>, %arg6: memref<128x128xf32, #tpu.memory_space<vmem>>, %arg7: memref<1x128xf32, #tpu.memory_space<vmem>>, %arg8: memref<128x128xf32, #tpu.memory_space<vmem>>, %arg9: memref<1x128xf32, #tpu.memory_space<vmem>>, %arg10: memref<8x128xf32, #tpu.memory_space<vmem>>) attributes {dimension_semantics = [#tpu.dimension_semantics<parallel>], iteration_bounds = array<i64: 1>, scalar_prefetch = 0 : i64, scratch_operands = 0 : i64, tpu.core_type = #tpu.core_type<tc>, window_params = [{transform_indices = @transform_0, window_bounds = array<i64: 8, 896>}, {pipeline_mode = #tpu.pipeline_mode<synchronous>, transform_indices = @transform_1, window_bounds = array<i64: 896, 128>}, {pipeline_mode = #tpu.pipeline_mode<synchronous>, transform_indices = @transform_2, window_bounds = array<i64: 1, 128>}, {pipeline_mode = #tpu.pipeline_mode<synchronous>, transform_indices = @transform_3, window_bounds = array<i64: 128, 128>}, {pipeline_mode = #tpu.pipeline_mode<synchronous>, transform_indices = @transform_4, window_bounds = array<i64: 1, 128>}, {pipeline_mode = #tpu.pipeline_mode<synchronous>, transform_indices = @transform_5, window_bounds = array<i64: 128, 128>}, {pipeline_mode = #tpu.pipeline_mode<synchronous>, transform_indices = @transform_6, window_bounds = array<i64: 1, 128>}, {pipeline_mode = #tpu.pipeline_mode<synchronous>, transform_indices = @transform_7, window_bounds = array<i64: 128, 128>}, {pipeline_mode = #tpu.pipeline_mode<synchronous>, transform_indices = @transform_8, window_bounds = array<i64: 1, 128>}, {transform_indices = @transform_9, window_bounds = array<i64: 8, 128>}]} {
    %c0 = arith.constant 0 : index
    %c0_0 = arith.constant 0 : index
    %0 = vector.load %arg1[%c0, %c0_0] : memref<8x896xf32, #tpu.memory_space<vmem>>, vector<8x896xf32>
    %c0_1 = arith.constant 0 : index
    %c0_2 = arith.constant 0 : index
    %1 = vector.load %arg2[%c0_1, %c0_2] : memref<896x128xf32, #tpu.memory_space<vmem>>, vector<896x128xf32>
    %cst = arith.constant dense<0.000000e+00> : vector<8x128xf32>
    %2 = tpu.matmul %0, %1, %cst {dimension_numbers = #tpu.dot_dimension_numbers<[1], [0], [0], [1], [0, 0, 1, 1], [], []>} : vector<8x896xf32>, vector<896x128xf32>, vector<8x128xf32> -> vector<8x128xf32>
    %c0_3 = arith.constant 0 : index
    %c0_4 = arith.constant 0 : index
    %3 = vector.load %arg3[%c0_3, %c0_4] : memref<1x128xf32, #tpu.memory_space<vmem>>, vector<1x128xf32>
    %4 = vector.broadcast %3 : vector<1x128xf32> to vector<8x128xf32>
    %5 = arith.addf %2, %4 : vector<8x128xf32>
    %cst_5 = arith.constant 0.000000e+00 : f32
    %6 = vector.broadcast %cst_5 : f32 to vector<8x128xf32>
    %7 = arith.maximumf %5, %6 : vector<8x128xf32>
    %c0_6 = arith.constant 0 : index
    %c0_7 = arith.constant 0 : index
    %8 = vector.load %arg4[%c0_6, %c0_7] : memref<128x128xf32, #tpu.memory_space<vmem>>, vector<128x128xf32>
    %cst_8 = arith.constant dense<0.000000e+00> : vector<8x128xf32>
    %9 = tpu.matmul %7, %8, %cst_8 {dimension_numbers = #tpu.dot_dimension_numbers<[1], [0], [0], [1], [0, 0, 1, 1], [], []>} : vector<8x128xf32>, vector<128x128xf32>, vector<8x128xf32> -> vector<8x128xf32>
    %c0_9 = arith.constant 0 : index
    %c0_10 = arith.constant 0 : index
    %10 = vector.load %arg5[%c0_9, %c0_10] : memref<1x128xf32, #tpu.memory_space<vmem>>, vector<1x128xf32>
    %11 = vector.broadcast %10 : vector<1x128xf32> to vector<8x128xf32>
    %12 = arith.addf %9, %11 : vector<8x128xf32>
    %cst_11 = arith.constant 0.000000e+00 : f32
    %13 = vector.broadcast %cst_11 : f32 to vector<8x128xf32>
    %14 = arith.maximumf %12, %13 : vector<8x128xf32>
    %c0_12 = arith.constant 0 : index
    %c0_13 = arith.constant 0 : index
    %15 = vector.load %arg6[%c0_12, %c0_13] : memref<128x128xf32, #tpu.memory_space<vmem>>, vector<128x128xf32>
    %cst_14 = arith.constant dense<0.000000e+00> : vector<8x128xf32>
    %16 = tpu.matmul %14, %15, %cst_14 {dimension_numbers = #tpu.dot_dimension_numbers<[1], [0], [0], [1], [0, 0, 1, 1], [], []>} : vector<8x128xf32>, vector<128x128xf32>, vector<8x128xf32> -> vector<8x128xf32>
    %c0_15 = arith.constant 0 : index
    %c0_16 = arith.constant 0 : index
    %17 = vector.load %arg7[%c0_15, %c0_16] : memref<1x128xf32, #tpu.memory_space<vmem>>, vector<1x128xf32>
    %18 = vector.broadcast %17 : vector<1x128xf32> to vector<8x128xf32>
    %19 = arith.addf %16, %18 : vector<8x128xf32>
    %cst_17 = arith.constant 0.000000e+00 : f32
    %20 = vector.broadcast %cst_17 : f32 to vector<8x128xf32>
    %21 = arith.maximumf %19, %20 : vector<8x128xf32>
    %c0_18 = arith.constant 0 : index
    %c0_19 = arith.constant 0 : index
    %22 = vector.load %arg8[%c0_18, %c0_19] : memref<128x128xf32, #tpu.memory_space<vmem>>, vector<128x128xf32>
    %cst_20 = arith.constant dense<0.000000e+00> : vector<8x128xf32>
    %23 = tpu.matmul %21, %22, %cst_20 {dimension_numbers = #tpu.dot_dimension_numbers<[1], [0], [0], [1], [0, 0, 1, 1], [], []>} : vector<8x128xf32>, vector<128x128xf32>, vector<8x128xf32> -> vector<8x128xf32>
    %c0_21 = arith.constant 0 : index
    %c0_22 = arith.constant 0 : index
    %24 = vector.load %arg9[%c0_21, %c0_22] : memref<1x128xf32, #tpu.memory_space<vmem>>, vector<1x128xf32>
    %25 = vector.broadcast %24 : vector<1x128xf32> to vector<8x128xf32>
    %26 = arith.addf %23, %25 : vector<8x128xf32>
    %c0_23 = arith.constant 0 : index
    %c0_24 = arith.constant 0 : index
    %27 = vector.load %arg10[%c0_23, %c0_24] : memref<8x128xf32, #tpu.memory_space<vmem>>, vector<8x128xf32>
    tpu.vector_store %arg10[%c0_23, %c0_24], %26 {strides = array<i32>} : memref<8x128xf32, #tpu.memory_space<vmem>>, vector<8x128xf32>,
    return
  }
  func.func @transform_0(%arg0: i32) -> (i32, i32) {
    %c0_i32 = arith.constant 0 : i32
    %c0_i32_0 = arith.constant 0 : i32
    return %arg0, %c0_i32 : i32, i32
  }
  func.func @transform_1(%arg0: i32) -> (i32, i32) {
    %c0_i32 = arith.constant 0 : i32
    %c0_i32_0 = arith.constant 0 : i32
    %c0_i32_1 = arith.constant 0 : i32
    return %c0_i32, %c0_i32_0 : i32, i32
  }
  func.func @transform_2(%arg0: i32) -> (i32, i32) {
    %c0_i32 = arith.constant 0 : i32
    %c0_i32_0 = arith.constant 0 : i32
    %c0_i32_1 = arith.constant 0 : i32
    return %c0_i32, %c0_i32_0 : i32, i32
  }
  func.func @transform_3(%arg0: i32) -> (i32, i32) {
    %c0_i32 = arith.constant 0 : i32
    %c0_i32_0 = arith.constant 0 : i32
    %c0_i32_1 = arith.constant 0 : i32
    return %c0_i32, %c0_i32_0 : i32, i32
  }
  func.func @transform_4(%arg0: i32) -> (i32, i32) {
    %c0_i32 = arith.constant 0 : i32
    %c0_i32_0 = arith.constant 0 : i32
    %c0_i32_1 = arith.constant 0 : i32
    return %c0_i32, %c0_i32_0 : i32, i32
  }
  func.func @transform_5(%arg0: i32) -> (i32, i32) {
    %c0_i32 = arith.constant 0 : i32
    %c0_i32_0 = arith.constant 0 : i32
    %c0_i32_1 = arith.constant 0 : i32
    return %c0_i32, %c0_i32_0 : i32, i32
  }
  func.func @transform_6(%arg0: i32) -> (i32, i32) {
    %c0_i32 = arith.constant 0 : i32
    %c0_i32_0 = arith.constant 0 : i32
    %c0_i32_1 = arith.constant 0 : i32
    return %c0_i32, %c0_i32_0 : i32, i32
  }
  func.func @transform_7(%arg0: i32) -> (i32, i32) {
    %c0_i32 = arith.constant 0 : i32
    %c0_i32_0 = arith.constant 0 : i32
    %c0_i32_1 = arith.constant 0 : i32
    return %c0_i32, %c0_i32_0 : i32, i32
  }
  func.func @transform_8(%arg0: i32) -> (i32, i32) {
    %c0_i32 = arith.constant 0 : i32
    %c0_i32_0 = arith.constant 0 : i32
    %c0_i32_1 = arith.constant 0 : i32
    return %c0_i32, %c0_i32_0 : i32, i32
  }
  func.func @transform_9(%arg0: i32) -> (i32, i32) {
    %c0_i32 = arith.constant 0 : i32
    %c0_i32_0 = arith.constant 0 : i32
    return %arg0, %c0_i32 : i32, i32
  }
}

</mosaic_0001>

<bundles_post_ra>
// kernel: tpu_custom_call.1
= control target key start
LH: loop header
LB: loop body
LE: loop exit
PB: predicated region body
PF: predicated region fallthrough
CT: control target
= control target key end

     0   :  { %14 = vsyncpa [#allocation3], 0  ;;  %s1662_s0 = inlined_call_operand.hbm [shape: f32[8,896], index: 0, kind: input, shape index: {}]   ;;  %s1663_s1 = inlined_call_operand.hbm [shape: f32[896,128], index: 1, kind: input, shape index: {}]   ;;  %s1664_s2 = inlined_call_operand.vmem [shape: f32[1,128], index: 2, kind: input, shape index: {}]   ;;  %s1665_s3 = inlined_call_operand.hbm [shape: f32[128,128], index: 3, kind: input, shape index: {}]   ;;  %s1666_s4 = inlined_call_operand.vmem [shape: f32[1,128], index: 4, kind: input, shape index: {}]   ;;  %s1667_s5 = inlined_call_operand.hbm [shape: f32[128,128], index: 5, kind: input, shape index: {}]   ;;  %s1668_s6 = inlined_call_operand.vmem [shape: f32[1,128], index: 6, kind: input, shape index: {}]   ;;  %s1669_s7 = inlined_call_operand.hbm [shape: f32[128,128], index: 7, kind: input, shape index: {}]   ;;  %s1670_s8 = inlined_call_operand.vmem [shape: f32[1,128], index: 8, kind: input, shape index: {}]   ;;  %s1671_s9 = inlined_call_operand.hbm [shape: f32[8,128], index: 9, kind: output, shape index: {}]  }
   0x1   :  { %15 = vsyncpa [#allocation6], 0 }
   0x2   :  { %16 = vsyncpa [#allocation9], 0 }
   0x3   :  { %17 = vsyncpa [#allocation4], 0  ;;  %s1465_s30 = smov [#allocation5]   ;;  %s1325_s13 = scalar_lea.hbm %s1663_s1, 14336 }
   0x4   :  { %s33_s10 = sshll.u32 %s1465_s30, 4  ;;  %p1326_p0 = scmp.ne.s32.totalorder %s1663_s1, %s1325_s13  ;;  %s34_s10 = int_to_ptr.vmem [resolvable:$true] %s33_s10 }
   0x5   :  { %p1329_p1 = scmp.lt.u32.totalorder %s1325_s13, %s1663_s1 }
   0x7   :  { %p1331_p2 = pnand %p1329_p1, %p1326_p0 }
   0x9   :  { %1334 = shalt.err (!%p1331_p2)
}
   0xa   :  { %s1335_s18 = scalar_lea.vmem %s34_s10, 14336  ;;  %p1340_p4 = scmp.lt.s32.totalorder %s34_s10, %s34_s10 }
   0xb   :  { %p1336_p3 = scmp.ne.s32.totalorder %s34_s10, %s1335_s18  ;;  %p1341_p5 = scmp.lt.s32.totalorder %s1335_s18, %s1335_s18 }
   0xd   :  { %p1342_p6 = por %p1341_p5, %p1340_p4 }
   0xf   :  { %p1343_p7 = pnand %p1342_p6, %p1336_p3 }
  0x11   :  { %1346 = shalt.err (!%p1343_p7)
}
  0x12   :  { %s1466_s19 = smov 128   ;;  %s1467_s20 = smov 8  }
  0x13   :  { %39 = dma.hbm_to_vmem [thread:$0]  %s1663_s1, 14336, %s34_s10, [#allocation6], %s1466_s19, %s1466_s19, %s1467_s20  }
  0x14   :  { %s1468_s23 = smov [#allocation8]   ;;  %s1469_s25 = smov [#allocation2]  }
  0x15   :  { %s61_s24 = sshll.u32 %s1468_s23, 4  ;;  %s24_s26 = sshll.u32 %s1469_s25, 4  ;;  %s62_s24 = int_to_ptr.vmem [resolvable:$true] %s61_s24  ;;  %s25_s26 = int_to_ptr.vmem [resolvable:$true] %s24_s26 }
  0x16   :  { %s1347_s29 = scalar_lea.hbm %s1667_s5, 2048 }
  0x17   :  { %p1348_p8 = scmp.ne.s32.totalorder %s1667_s5, %s1347_s29  ;;  %p1351_p9 = scmp.lt.u32.totalorder %s1347_s29, %s1667_s5 }
  0x19   :  { %p1353_p10 = pnand %p1351_p9, %p1348_p8 }
  0x1b   :  { %1356 = shalt.err (!%p1353_p10)
}
  0x1c   :  { %s1357_s1 = scalar_lea.vmem %s62_s24, 2048  ;;  %p1362_p12 = scmp.lt.s32.totalorder %s62_s24, %s62_s24 }
  0x1d   :  { %p1358_p11 = scmp.ne.s32.totalorder %s62_s24, %s1357_s1  ;;  %p1363_p13 = scmp.lt.s32.totalorder %s1357_s1, %s1357_s1 }
  0x1f   :  { %p1364_p0 = por %p1363_p13, %p1362_p12 }
  0x21   :  { %p1365_p1 = pnand %p1364_p0, %p1358_p11 }
  0x23   :  { %1368 = shalt.err (!%p1365_p1)
}
  0x24   :  { %67 = dma.hbm_to_vmem [thread:$0]  %s1667_s5, 2048, %s62_s24, [#allocation9], %s1466_s19, %s1466_s19, %s1467_s20  }
  0x25   :  { %s1369_s17 = scalar_lea.hbm %s1662_s0, 896 }
  0x26   :  { %p1370_p2 = scmp.ne.s32.totalorder %s1662_s0, %s1369_s17  ;;  %p1373_p3 = scmp.lt.u32.totalorder %s1369_s17, %s1662_s0 }
  0x28   :  { %p1375_p4 = pnand %p1373_p3, %p1370_p2 }
  0x2a   :  { %1378 = shalt.err (!%p1375_p4)
}
  0x2b   :  { %s1379_s25 = scalar_lea.vmem %s25_s26, 896  ;;  %p1384_p6 = scmp.lt.s32.totalorder %s25_s26, %s25_s26 }
  0x2c   :  { %p1380_p5 = scmp.ne.s32.totalorder %s25_s26, %s1379_s25  ;;  %p1385_p7 = scmp.lt.s32.totalorder %s1379_s25, %s1379_s25 }
  0x2e   :  { %p1386_p8 = por %p1385_p7, %p1384_p6 }
  0x30   :  { %p1387_p9 = pnand %p1386_p8, %p1380_p5 }
  0x32   :  { %1390 = shalt.err (!%p1387_p9)
}
  0x33   :  { %27 = dma.hbm_to_vmem [thread:$0]  %s1662_s0, 896, %s25_s26, [#allocation3]  }
  0x34   :  { %s1470_s27 = smov [#allocation7]   ;;  %s1471_s29 = smov [#allocation10]  }
  0x35   :  { %s47_s28 = sshll.u32 %s1470_s27, 4  ;;  %s75_s30 = sshll.u32 %s1471_s29, 4  ;;  %s48_s28 = int_to_ptr.vmem [resolvable:$true] %s47_s28  ;;  %s76_s30 = int_to_ptr.vmem [resolvable:$true] %s75_s30 }
  0x36   :  { %s1391_s13 = scalar_lea.hbm %s1665_s3, 2048 }
  0x37   :  { %p1392_p10 = scmp.ne.s32.totalorder %s1665_s3, %s1391_s13  ;;  %p1395_p11 = scmp.lt.u32.totalorder %s1391_s13, %s1665_s3 }
  0x39   :  { %p1397_p12 = pnand %p1395_p11, %p1392_p10 }
  0x3b   :  { %1400 = shalt.err (!%p1397_p12)
}
  0x3c   :  { %s1401_s0 = scalar_lea.vmem %s48_s28, 2048  ;;  %p1406_p0 = scmp.lt.s32.totalorder %s48_s28, %s48_s28 }
  0x3d   :  { %p1402_p13 = scmp.ne.s32.totalorder %s48_s28, %s1401_s0  ;;  %p1407_p1 = scmp.lt.s32.totalorder %s1401_s0, %s1401_s0 }
  0x3f   :  { %p1408_p2 = por %p1407_p1, %p1406_p0 }
  0x41   :  { %p1409_p3 = pnand %p1408_p2, %p1402_p13 }
  0x43   :  { %1412 = shalt.err (!%p1409_p3)
}
  0x44   :  { %53 = dma.hbm_to_vmem [thread:$0]  %s1665_s3, 2048, %s48_s28, [#allocation6], %s1466_s19, %s1466_s19, %s1467_s20  }
  0x45   :  { %s1413_s21 = scalar_lea.hbm %s1669_s7, 2048 }
  0x46   :  { %p1414_p4 = scmp.ne.s32.totalorder %s1669_s7, %s1413_s21  ;;  %p1417_p5 = scmp.lt.u32.totalorder %s1413_s21, %s1669_s7 }
  0x48   :  { %p1419_p6 = pnand %p1417_p5, %p1414_p4 }
  0x4a   :  { %1422 = shalt.err (!%p1419_p6)
}
  0x4b   :  { %s1423_s24 = scalar_lea.vmem %s76_s30, 2048  ;;  %p1428_p8 = scmp.lt.s32.totalorder %s76_s30, %s76_s30 }
  0x4c   :  { %p1424_p7 = scmp.ne.s32.totalorder %s76_s30, %s1423_s24  ;;  %p1429_p9 = scmp.lt.s32.totalorder %s1423_s24, %s1423_s24 }
  0x4e   :  { %p1430_p10 = por %p1429_p9, %p1428_p8 }
  0x50   :  { %p1431_p11 = pnand %p1430_p10, %p1424_p7 }
  0x52   :  { %1434 = shalt.err (!%p1431_p11)
}
  0x53   :  { %81 = dma.hbm_to_vmem [thread:$0]  %s1669_s7, 2048, %s76_s30, [#allocation9], %s1466_s19, %s1466_s19, %s1467_s20  }
  0x54   :  { %1457 = dma.done.wait [#allocation3], 896  }
  0x55   :  { %1458 = vsyncadd [#allocation3], 4294966400 }
  0x56   :  { %1459 = dma.done.wait [#allocation6], 16384  }
  0x57   :  { %1460 = vsyncadd [#allocation6], 4294950912 }
  0x58   :  { %1461 = dma.done.wait [#allocation9], 4096  }
  0x59   :  { %1462 = vsyncadd [#allocation9], 4294963200  ;;  %v122_v0 = vld [vmem:[#allocation5 + $0x80] sm:$0xff]  ;;  %v123_v1 = vld [vmem:[#allocation5 + $0x88] sm:$0xff]  ;;  %vm1473_vm0 = vmmov 0   ;;  %s1475_s11 = smov [#allocation11]  }
  0x5a   :  { %v106_v2 = vld [vmem:[#allocation5] sm:$0xff]  ;;  %v1122_v3 = vpack.c.bf16 %v123_v1, %v122_v0  ;;  %v107_v4 = vld [vmem:[#allocation5 + $0x8] sm:$0xff]  ;;  %v124_v11 = vld [vmem:[#allocation5 + $0x90] sm:$0xff]  ;;  %s794_s12 = sshll.u32 %s1475_s11, 4  ;;  %s795_s12 = int_to_ptr.vmem [resolvable:$true] %s794_s12 }
  0x5b   :  { %v154_v5 = vld [vmem:[#allocation5 + $0x180] sm:$0xff]  ;;  %v155_v6 = vld [vmem:[#allocation5 + $0x188] sm:$0xff]  ;;  %v1124_v7 = vpack.c.bf16 %v107_v4, %v106_v2  ;;  %v125_v13 = vld [vmem:[#allocation5 + $0x98] sm:$0xff]  ;;  %s1435_s13 = scalar_lea.vmem %s795_s12, 128  ;;  %p1440_p13 = scmp.lt.s32.totalorder %s795_s12, %s795_s12 }
  0x5c   :  { %v1154_v8 = vpack.c.bf16 %v155_v6, %v154_v5  ;;  %v138_v9 = vld [vmem:[#allocation5 + $0x100] sm:$0xff]  ;;  %v139_v10 = vld [vmem:[#allocation5 + $0x108] sm:$0xff]  ;;  %1123 = vmatprep.subr.bf16.mxu0 %v1122_v3  ;;  %v108_v14 = vld [vmem:[#allocation5 + $0x10] sm:$0xff]  ;;  %v1126_v16 = vpack.c.bf16 %v125_v13, %v124_v11  ;;  %p1436_p12 = scmp.ne.s32.totalorder %s795_s12, %s1435_s13  ;;  %p1441_p0 = scmp.lt.s32.totalorder %s1435_s13, %s1435_s13 }
  0x5d   :  { %v1156_v12 = vpack.c.bf16 %v139_v10, %v138_v9  ;;  %v109_v15 = vld [vmem:[#allocation5 + $0x18] sm:$0xff]  ;;  %1125 = vmatpush3.bf16.msra.mxu0 %v1124_v7  ;;  %v156_v18 = vld [vmem:[#allocation5 + $0x190] sm:$0xff]  ;;  %v126_v23 = vld [vmem:[#allocation5 + $0xa0] sm:$0xff] }
  0x5e   :  { %1155 = vmatprep.subr.bf16.mxu1 %v1154_v8  ;;  %v1128_v17 = vpack.c.bf16 %v109_v15, %v108_v14  ;;  %v157_v19 = vld [vmem:[#allocation5 + $0x198] sm:$0xff]  ;;  %v140_v20 = vld [vmem:[#allocation5 + $0x110] sm:$0xff]  ;;  %v127_v24 = vld [vmem:[#allocation5 + $0xa8] sm:$0xff]  ;;  %1127 = vmatprep.subr.bf16.mxu0 %v1126_v16  ;;  %p1442_p1 = por %p1441_p0, %p1440_p13 }
  0x5f   :  { %1157 = vmatpush3.bf16.msra.mxu1 %v1156_v12  ;;  %v1158_v21 = vpack.c.bf16 %v157_v19, %v156_v18  ;;  %v141_v22 = vld [vmem:[#allocation5 + $0x118] sm:$0xff]  ;;  %v1130_v26 = vpack.c.bf16 %v127_v24, %v126_v23  ;;  %v110_v27 = vld [vmem:[#allocation5 + $0x20] sm:$0xff]  ;;  %v111_v28 = vld [vmem:[#allocation5 + $0x28] sm:$0xff] }
  0x60   :  { %v1160_v25 = vpack.c.bf16 %v141_v22, %v140_v20  ;;  %v158_v29 = vld [vmem:[#allocation5 + $0x1a0] sm:$0xff]  ;;  %v159_v30 = vld [vmem:[#allocation5 + $0x1a8] sm:$0xff]  ;;  %v1132_v33 = vpack.c.bf16 %v111_v28, %v110_v27  ;;  %v128_v35 = vld [vmem:[#allocation5 + $0xb0] sm:$0xff]  ;;  %p1443_p2 = pnand %p1442_p1, %p1436_p12 }
  0x61   :  { %1159 = vmatprep.subr.bf16.mxu1 %v1158_v21  ;;  %v142_v31 = vld [vmem:[#allocation5 + $0x120] sm:$0xff]  ;;  %v143_v32 = vld [vmem:[#allocation5 + $0x128] sm:$0xff]  ;;  %1129 = vmatpush3.bf16.msra.mxu0 %v1128_v17  ;;  %v1162_v34 = vpack.c.bf16 %v159_v30, %v158_v29  ;;  %v129_v36 = vld [vmem:[#allocation5 + $0xb8] sm:$0xff] }
  0x62   :  { %v112_v37 = vld [vmem:[#allocation5 + $0x30] sm:$0xff]  ;;  %1131 = vmatprep.subr.bf16.mxu0 %v1130_v26  ;;  %v1164_v38 = vpack.c.bf16 %v143_v32, %v142_v31  ;;  %v1134_v39 = vpack.c.bf16 %v129_v36, %v128_v35  ;;  %v113_v40 = vld [vmem:[#allocation5 + $0x38] sm:$0xff]  ;;  %v130_v46 = vld [vmem:[#allocation5 + $0xc0] sm:$0xff] }
  0x63   :  { %1161 = vmatpush3.bf16.msra.mxu1 %v1160_v25  ;;  %v160_v41 = vld [vmem:[#allocation5 + $0x1b0] sm:$0xff]  ;;  %v161_v42 = vld [vmem:[#allocation5 + $0x1b8] sm:$0xff]  ;;  %v131_v47 = vld [vmem:[#allocation5 + $0xc8] sm:$0xff]  ;;  %v1136_v48 = vpack.c.bf16 %v113_v40, %v112_v37 }
  0x64   :  { %1163 = vmatprep.subr.bf16.mxu1 %v1162_v34  ;;  %v1166_v43 = vpack.c.bf16 %v161_v42, %v160_v41  ;;  %v144_v44 = vld [vmem:[#allocation5 + $0x130] sm:$0xff]  ;;  %v145_v45 = vld [vmem:[#allocation5 + $0x138] sm:$0xff]  ;;  %v162_v49 = vld [vmem:[#allocation5 + $0x1c0] sm:$0xff]  ;;  %v1138_v52 = vpack.c.bf16 %v131_v47, %v130_v46 }
  0x65   :  { %1133 = vmatpush3.bf16.msra.mxu0 %v1132_v33  ;;  %v163_v50 = vld [vmem:[#allocation5 + $0x1c8] sm:$0xff]  ;;  %v1168_v51 = vpack.c.bf16 %v145_v45, %v144_v44  ;;  %v114_v53 = vld [vmem:[#allocation5 + $0x40] sm:$0xff]  ;;  %v132_v58 = vld [vmem:[#allocation5 + $0xd0] sm:$0xff] }
  0x66   :  { %1135 = vmatprep.subr.bf16.mxu0 %v1134_v39  ;;  %v115_v54 = vld [vmem:[#allocation5 + $0x48] sm:$0xff]  ;;  %v146_v55 = vld [vmem:[#allocation5 + $0x140] sm:$0xff]  ;;  %v1170_v56 = vpack.c.bf16 %v163_v50, %v162_v49  ;;  %v133_v59 = vld [vmem:[#allocation5 + $0xd8] sm:$0xff] }
  0x67   :  { %1165 = vmatpush3.bf16.msra.mxu1 %v1164_v38  ;;  %v147_v57 = vld [vmem:[#allocation5 + $0x148] sm:$0xff]  ;;  %v164_v60 = vld [vmem:[#allocation5 + $0x1d0] sm:$0xff]  ;;  %v165_v61 = vld [vmem:[#allocation5 + $0x1d8] sm:$0xff]  ;;  %v1140_v62 = vpack.c.bf16 %v115_v54, %v114_v53  ;;  %v1142_v0 = vpack.c.bf16 %v133_v59, %v132_v58 }
  0x68   :  { %1167 = vmatprep.subr.bf16.mxu1 %v1166_v43  ;;  %v1172_v63 = vpack.c.bf16 %v147_v57, %v146_v55  ;;  %v116_v1 = vld [vmem:[#allocation5 + $0x50] sm:$0xff]  ;;  %v117_v2 = vld [vmem:[#allocation5 + $0x58] sm:$0xff]  ;;  %v1174_v4 = vpack.c.bf16 %v165_v61, %v164_v60  ;;  %v134_v6 = vld [vmem:[#allocation5 + $0xe0] sm:$0xff] }
  0x69   :  { %1137 = vmatpush3.bf16.msra.mxu0 %v1136_v48  ;;  %v148_v3 = vld [vmem:[#allocation5 + $0x150] sm:$0xff]  ;;  %v149_v5 = vld [vmem:[#allocation5 + $0x158] sm:$0xff]  ;;  %v135_v7 = vld [vmem:[#allocation5 + $0xe8] sm:$0xff]  ;;  %v1144_v10 = vpack.c.bf16 %v117_v2, %v116_v1  ;;  %v1474_v1 = vmov 0.0  }
  0x6a   :  { %1139 = vmatprep.subr.bf16.mxu0 %v1138_v52  ;;  %v166_v8 = vld [vmem:[#allocation5 + $0x1e0] sm:$0xff]  ;;  %v167_v9 = vld [vmem:[#allocation5 + $0x1e8] sm:$0xff]  ;;  %v100_v12 = vld [vmem:[#allocation2 + $0x8] sm:$0xff]  ;;  %v1176_v13 = vpack.c.bf16 %v149_v5, %v148_v3  ;;  %v1146_v14 = vpack.c.bf16 %v135_v7, %v134_v6 }
  0x6b   :  { %1169 = vmatpush3.bf16.msra.mxu1 %v1168_v51  ;;  %v118_v11 = vld [vmem:[#allocation5 + $0x60] sm:$0xff]  ;;  %v119_v15 = vld [vmem:[#allocation5 + $0x68] sm:$0xff]  ;;  %v1178_v18 = vpack.c.bf16 %v167_v9, %v166_v8  ;;  %v136_v19 = vld [vmem:[#allocation5 + $0xf0] sm:$0xff]  ;;  %289 = vmatprep.mubr.f32.mxu0 %v100_v12  ;;  %v1472_v51 = vmov 0.0|0.0  }
  0x6c   :  { %1171 = vmatprep.subr.bf16.mxu1 %v1170_v56  ;;  %v150_v16 = vld [vmem:[#allocation5 + $0x160] sm:$0xff]  ;;  %v151_v17 = vld [vmem:[#allocation5 + $0x168] sm:$0xff]  ;;  %v137_v20 = vld [vmem:[#allocation5 + $0xf8] sm:$0xff]  ;;  %v1148_v24 = vpack.c.bf16 %v119_v15, %v118_v11 }
  0x6d   :  { %1141 = vmatpush3.bf16.msra.mxu0 %v1140_v62  ;;  %v102_v21 = vld [vmem:[#allocation2 + $0x18] sm:$0xff]  ;;  %v168_v22 = vld [vmem:[#allocation5 + $0x1f0] sm:$0xff]  ;;  %v169_v23 = vld [vmem:[#allocation5 + $0x1f8] sm:$0xff]  ;;  %v1180_v25 = vpack.c.bf16 %v151_v17, %v150_v16  ;;  %v1150_v26 = vpack.c.bf16 %v137_v20, %v136_v19 }
  0x6e   :  { %1143 = vmatprep.subr.bf16.mxu0 %v1142_v0  ;;  %359 = vmatprep.mubr.f32.mxu1 %v102_v21  ;;  %v120_v27 = vld [vmem:[#allocation5 + $0x70] sm:$0xff]  ;;  %v121_v28 = vld [vmem:[#allocation5 + $0x78] sm:$0xff]  ;;  %v1182_v30 = vpack.c.bf16 %v169_v23, %v168_v22  ;;  %v186_v32 = vld [vmem:[#allocation5 + $0x280] sm:$0xff] }
  0x6f   :  { %1173 = vmatpush3.bf16.msra.mxu1 %v1172_v63  ;;  %v152_v29 = vld [vmem:[#allocation5 + $0x170] sm:$0xff]  ;;  %v153_v31 = vld [vmem:[#allocation5 + $0x178] sm:$0xff]  ;;  %v187_v33 = vld [vmem:[#allocation5 + $0x288] sm:$0xff]  ;;  %v1152_v34 = vpack.c.bf16 %v121_v28, %v120_v27 }
  0x70   :  { %1175 = vmatprep.subr.bf16.mxu1 %v1174_v4  ;;  %v1184_v35 = vpack.c.bf16 %v153_v31, %v152_v29  ;;  %v1186_v36 = vpack.c.bf16 %v187_v33, %v186_v32  ;;  %v170_v37 = vld [vmem:[#allocation5 + $0x200] sm:$0xff]  ;;  %v171_v38 = vld [vmem:[#allocation5 + $0x208] sm:$0xff]  ;;  %v188_v39 = vld [vmem:[#allocation5 + $0x290] sm:$0xff] }
  0x71   :  { %1145 = vmatpush3.bf16.msra.mxu0 %v1144_v10  ;;  %v189_v40 = vld [vmem:[#allocation5 + $0x298] sm:$0xff]  ;;  %v202_v41 = vld [vmem:[#allocation5 + $0x300] sm:$0xff]  ;;  %v203_v42 = vld [vmem:[#allocation5 + $0x308] sm:$0xff]  ;;  %v1188_v44 = vpack.c.bf16 %v171_v38, %v170_v37 }
  0x72   :  { %1147 = vmatprep.subr.bf16.mxu0 %v1146_v14  ;;  %v99_v43 = vld [vmem:[#allocation2] sm:$0xff]  ;;  %v101_v45 = vld [vmem:[#allocation2 + $0x10] sm:$0xff]  ;;  %v1190_v46 = vpack.c.bf16 %v189_v40, %v188_v39  ;;  %v172_v47 = vld [vmem:[#allocation5 + $0x210] sm:$0xff]  ;;  %v1219_v49 = vpack.c.bf16 %v203_v42, %v202_v41 }
  0x73   :  { %1177 = vmatpush3.bf16.msra.mxu1 %v1176_v13  ;;  %v173_v48 = vld [vmem:[#allocation5 + $0x218] sm:$0xff]  ;;  %v190_v50 = vld [vmem:[#allocation5 + $0x2a0] sm:$0xff]  ;;  %v191_v52 = vld [vmem:[#allocation5 + $0x2a8] sm:$0xff] }
  0x74   :  { %1179 = vmatprep.subr.bf16.mxu1 %v1178_v18  ;;  %v204_v53 = vld [vmem:[#allocation5 + $0x310] sm:$0xff]  ;;  %v205_v54 = vld [vmem:[#allocation5 + $0x318] sm:$0xff]  ;;  %v1192_v55 = vpack.c.bf16 %v173_v48, %v172_v47  ;;  %v174_v56 = vld [vmem:[#allocation5 + $0x220] sm:$0xff]  ;;  %v1194_v57 = vpack.c.bf16 %v191_v52, %v190_v50 }
  0x75   :  { %1149 = vmatpush3.bf16.msra.mxu0 %v1148_v24  ;;  %v175_v58 = vld [vmem:[#allocation5 + $0x228] sm:$0xff]  ;;  %v1222_v59 = vpack.c.bf16 %v205_v54, %v204_v53  ;;  %v192_v60 = vld [vmem:[#allocation5 + $0x2b0] sm:$0xff]  ;;  %v193_v61 = vld [vmem:[#allocation5 + $0x2b8] sm:$0xff] }
  0x76   :  { %1151 = vmatprep.subr.bf16.mxu0 %v1150_v26  ;;  %v206_v62 = vld [vmem:[#allocation5 + $0x320] sm:$0xff]  ;;  %v207_v63 = vld [vmem:[#allocation5 + $0x328] sm:$0xff]  ;;  %v104_v0 = vld [vmem:[#allocation2 + $0x28] sm:$0xff]  ;;  %v1196_v2 = vpack.c.bf16 %v175_v58, %v174_v56  ;;  %v1198_v3 = vpack.c.bf16 %v193_v61, %v192_v60 }
  0x77   :  { %1181 = vmatpush3.bf16.msra.mxu1 %v1180_v25  ;;  %v176_v4 = vld [vmem:[#allocation5 + $0x230] sm:$0xff]  ;;  %v177_v5 = vld [vmem:[#allocation5 + $0x238] sm:$0xff]  ;;  %v1225_v6 = vpack.c.bf16 %v207_v63, %v206_v62  ;;  %v194_v7 = vld [vmem:[#allocation5 + $0x2c0] sm:$0xff] }
  0x78   :  { %1183 = vmatprep.subr.bf16.mxu1 %v1182_v30  ;;  %v195_v8 = vld [vmem:[#allocation5 + $0x2c8] sm:$0xff]  ;;  %v208_v9 = vld [vmem:[#allocation5 + $0x330] sm:$0xff]  ;;  %v209_v10 = vld [vmem:[#allocation5 + $0x338] sm:$0xff]  ;;  %v1200_v11 = vpack.c.bf16 %v177_v5, %v176_v4 }
  0x79   :  { %1153 = vmatpush3.bf16.msra.mxu0 %v1152_v34  ;;  %v1202_v12 = vpack.c.bf16 %v195_v8, %v194_v7  ;;  %v178_v13 = vld [vmem:[#allocation5 + $0x240] sm:$0xff]  ;;  %v179_v14 = vld [vmem:[#allocation5 + $0x248] sm:$0xff]  ;;  %v1228_v15 = vpack.c.bf16 %v209_v10, %v208_v9  ;;  %v196_v16 = vld [vmem:[#allocation5 + $0x2d0] sm:$0xff] }
  0x7a   :  { %1187 = vmatprep.subr.bf16.mxu0 %v1186_v36  ;;  %v197_v17 = vld [vmem:[#allocation5 + $0x2d8] sm:$0xff]  ;;  %v210_v18 = vld [vmem:[#allocation5 + $0x340] sm:$0xff]  ;;  %v211_v19 = vld [vmem:[#allocation5 + $0x348] sm:$0xff]  ;;  %v1204_v20 = vpack.c.bf16 %v179_v14, %v178_v13 }
  0x7b   :  { %1185 = vmatpush3.bf16.msra.mxu1 %v1184_v35  ;;  %v1206_v21 = vpack.c.bf16 %v197_v17, %v196_v16  ;;  %v180_v22 = vld [vmem:[#allocation5 + $0x250] sm:$0xff]  ;;  %v181_v23 = vld [vmem:[#allocation5 + $0x258] sm:$0xff]  ;;  %v1231_v24 = vpack.c.bf16 %v211_v19, %v210_v18  ;;  %v198_v25 = vld [vmem:[#allocation5 + $0x2e0] sm:$0xff] }
  0x7c   :  { %1218 = vmatprep.subr.bf16.mxu1 %v1472_v51  ;;  %290 = vmatmul.mubr.f32.vlgmr.msra.gmra.mrb[0].mxu0 %v99_v43  ;;  %v199_v26 = vld [vmem:[#allocation5 + $0x2e8] sm:$0xff]  ;;  %v212_v27 = vld [vmem:[#allocation5 + $0x350] sm:$0xff]  ;;  %v213_v28 = vld [vmem:[#allocation5 + $0x358] sm:$0xff]  ;;  %v1208_v29 = vpack.c.bf16 %v181_v23, %v180_v22 }
  0x7d   :  { %1189 = vmatpush3.bf16.msra.mxu0 %v1188_v44  ;;  %429 = vmatprep.mubr.f32.mxu0 %v104_v0  ;;  %v1210_v30 = vpack.c.bf16 %v199_v26, %v198_v25  ;;  %v182_v31 = vld [vmem:[#allocation5 + $0x260] sm:$0xff]  ;;  %v183_v32 = vld [vmem:[#allocation5 + $0x268] sm:$0xff]  ;;  %v1234_v33 = vpack.c.bf16 %v213_v28, %v212_v27  ;;  %v200_v34 = vld [vmem:[#allocation5 + $0x2f0] sm:$0xff] }
  0x7e   :  { %360 = vmatmul.mubr.f32.vlgmr.msra.gmra.mrb[0].mxu1 %v101_v45  ;;  %1191 = vmatprep.subr.bf16.mxu0 %v1190_v46  ;;  %v201_v35 = vld [vmem:[#allocation5 + $0x2f8] sm:$0xff]  ;;  %v214_v36 = vld [vmem:[#allocation5 + $0x360] sm:$0xff]  ;;  %v215_v37 = vld [vmem:[#allocation5 + $0x368] sm:$0xff]  ;;  %v1212_v38 = vpack.c.bf16 %v183_v32, %v182_v31 }
  0x7f   :  { %1220 = vmatpush3.bf16.msra.mxu1 %v1219_v49  ;;  %1014 = vmatprep.mubr.msk.f32.mxu1 %vm1473_vm0, %v1474_v1  ;;  %v1214_v39 = vpack.c.bf16 %v201_v35, %v200_v34  ;;  %v184_v40 = vld [vmem:[#allocation5 + $0x270] sm:$0xff]  ;;  %v185_v41 = vld [vmem:[#allocation5 + $0x278] sm:$0xff]  ;;  %v1237_v42 = vpack.c.bf16 %v215_v37, %v214_v36  ;;  %v103_v47 = vld [vmem:[#allocation2 + $0x20] sm:$0xff] }
  0x80   :  { %1221 = vmatprep.subr.bf16.mxu1 %v1472_v51  ;;  %v216_v43 = vld [vmem:[#allocation5 + $0x370] sm:$0xff]  ;;  %v217_v44 = vld [vmem:[#allocation5 + $0x378] sm:$0xff]  ;;  %v1216_v45 = vpack.c.bf16 %v185_v41, %v184_v40  ;;  %v506_v49 = vld [vmem:[#allocation7] sm:$0xff] }
  0x81   :  { %1193 = vmatpush3.bf16.msra.mxu0 %v1192_v55  ;;  %v1240_v46 = vpack.c.bf16 %v217_v44, %v216_v43  ;;  %v105_v48 = vld [vmem:[#allocation2 + $0x30] sm:$0xff]  ;;  %v507_v50 = vld [vmem:[#allocation7 + $0x8] sm:$0xff]  ;;  %v508_v52 = vld [vmem:[#allocation7 + $0x10] sm:$0xff] }
  0x82   :  { %1195 = vmatprep.subr.bf16.mxu0 %v1194_v57  ;;  %v1243_v53 = vpack.c.bf16 %v507_v50, %v506_v49  ;;  %v509_v54 = vld [vmem:[#allocation7 + $0x18] sm:$0xff]  ;;  %v510_v56 = vld [vmem:[#allocation7 + $0x20] sm:$0xff]  ;;  %v511_v57 = vld [vmem:[#allocation7 + $0x28] sm:$0xff] }
  0x83   :  { %1223 = vmatpush3.bf16.msra.mxu1 %v1222_v59  ;;  %v1246_v55 = vpack.c.bf16 %v509_v54, %v508_v52  ;;  %v1249_v58 = vpack.c.bf16 %v511_v57, %v510_v56  ;;  %v512_v59 = vld [vmem:[#allocation7 + $0x30] sm:$0xff]  ;;  %v513_v60 = vld [vmem:[#allocation7 + $0x38] sm:$0xff]  ;;  %v514_v62 = vld [vmem:[#allocation7 + $0x40] sm:$0xff] }
  0x84   :  { %1224 = vmatprep.subr.bf16.mxu1 %v1472_v51  ;;  %v1252_v61 = vpack.c.bf16 %v513_v60, %v512_v59  ;;  %v515_v63 = vld [vmem:[#allocation7 + $0x48] sm:$0xff]  ;;  %v518_v5 = vld [vmem:[#allocation7 + $0x60] sm:$0xff]  ;;  %v520_v8 = vld [vmem:[#allocation7 + $0x70] sm:$0xff] }
  0x85   :  { %1197 = vmatpush3.bf16.msra.mxu0 %v1196_v2  ;;  %v1255_v0 = vpack.c.bf16 %v515_v63, %v514_v62  ;;  %v516_v2 = vld [vmem:[#allocation7 + $0x50] sm:$0xff]  ;;  %v521_v9 = vld [vmem:[#allocation7 + $0x78] sm:$0xff]  ;;  %v604_v17 = vld [vmem:[#allocation8 + $0x20] sm:$0xff] }
  0x86   :  { %1199 = vmatprep.subr.bf16.mxu0 %v1198_v3  ;;  %v517_v3 = vld [vmem:[#allocation7 + $0x58] sm:$0xff]  ;;  %v1264_v10 = vpack.c.bf16 %v521_v9, %v520_v8  ;;  %v602_v13 = vld [vmem:[#allocation8 + $0x10] sm:$0xff]  ;;  %v605_v18 = vld [vmem:[#allocation8 + $0x28] sm:$0xff] }
  0x87   :  { %1226 = vmatpush3.bf16.msra.mxu1 %v1225_v6  ;;  %v1258_v4 = vpack.c.bf16 %v517_v3, %v516_v2  ;;  %v519_v6 = vld [vmem:[#allocation7 + $0x68] sm:$0xff]  ;;  %v1273_v19 = vpack.c.bf16 %v605_v18, %v604_v17  ;;  %v608_v23 = vld [vmem:[#allocation8 + $0x40] sm:$0xff]  ;;  %v610_v26 = vld [vmem:[#allocation8 + $0x50] sm:$0xff] }
  0x88   :  { %1227 = vmatprep.subr.bf16.mxu1 %v1472_v51  ;;  %v1261_v7 = vpack.c.bf16 %v519_v6, %v518_v5  ;;  %v611_v27 = vld [vmem:[#allocation8 + $0x58] sm:$0xff]  ;;  %v614_v49 = vld [vmem:[#allocation8 + $0x70] sm:$0xff]  ;;  %v695_v54 = vld [vmem:[#allocation10 + $0x8] sm:$0xff] }
  0x89   :  { %1201 = vmatpush3.bf16.msra.mxu0 %v1200_v11  ;;  %v600_v11 = vld [vmem:[#allocation8] sm:$0xff]  ;;  %v1282_v28 = vpack.c.bf16 %v611_v27, %v610_v26  ;;  %v615_v50 = vld [vmem:[#allocation8 + $0x78] sm:$0xff]  ;;  %v699_v60 = vld [vmem:[#allocation10 + $0x28] sm:$0xff] }
  0x8a   :  { %1203 = vmatprep.subr.bf16.mxu0 %v1202_v12  ;;  %v601_v12 = vld [vmem:[#allocation8 + $0x8] sm:$0xff]  ;;  %v1288_v52 = vpack.c.bf16 %v615_v50, %v614_v49  ;;  %v697_v57 = vld [vmem:[#allocation10 + $0x18] sm:$0xff]  ;;  %v698_v59 = vld [vmem:[#allocation10 + $0x20] sm:$0xff] }
  0x8b   :  { %1229 = vmatpush3.bf16.msra.mxu1 %v1228_v15  ;;  %v1267_v14 = vpack.c.bf16 %v601_v12, %v600_v11  ;;  %v603_v15 = vld [vmem:[#allocation8 + $0x18] sm:$0xff]  ;;  %v703_v2 = vld [vmem:[#allocation10 + $0x48] sm:$0xff] }
  0x8c   :  { %1230 = vmatprep.subr.bf16.mxu1 %v1472_v51  ;;  %v1270_v16 = vpack.c.bf16 %v603_v15, %v602_v13  ;;  %v701_v62 = vld [vmem:[#allocation10 + $0x38] sm:$0xff]  ;;  %v707_v8 = vld [vmem:[#allocation10 + $0x68] sm:$0xff]  ;;  %v708_v15 = vld [vmem:[#allocation10 + $0x70] sm:$0xff] }
  0x8d   :  { %1205 = vmatpush3.bf16.msra.mxu0 %v1204_v20  ;;  %v606_v20 = vld [vmem:[#allocation8 + $0x30] sm:$0xff]  ;;  %v705_v5 = vld [vmem:[#allocation10 + $0x58] sm:$0xff]  ;;  %v807_v18 = vld [vmem:[%s1668_s6] ss:$0 sm:$0xff] }
  0x8e   :  { %1207 = vmatprep.subr.bf16.mxu0 %v1206_v21  ;;  %v607_v21 = vld [vmem:[#allocation8 + $0x38] sm:$0xff] }
  0x8f   :  { %1232 = vmatpush3.bf16.msra.mxu1 %v1231_v24  ;;  %v1276_v22 = vpack.c.bf16 %v607_v21, %v606_v20  ;;  %v609_v24 = vld [vmem:[#allocation8 + $0x48] sm:$0xff] }
  0x90   :  { %1233 = vmatprep.subr.bf16.mxu1 %v1472_v51  ;;  %v1279_v25 = vpack.c.bf16 %v609_v24, %v608_v23 }
  0x91   :  { %1209 = vmatpush3.bf16.msra.mxu0 %v1208_v29  ;;  %v612_v29 = vld [vmem:[#allocation8 + $0x60] sm:$0xff] }
  0x92   :  { %1211 = vmatprep.subr.bf16.mxu0 %v1210_v30  ;;  %v613_v30 = vld [vmem:[#allocation8 + $0x68] sm:$0xff] }
  0x93   :  { %1235 = vmatpush3.bf16.msra.mxu1 %v1234_v33  ;;  %v1285_v31 = vpack.c.bf16 %v613_v30, %v612_v29  ;;  %v805_v33 = vld [vmem:[%s1664_s2] ss:$0 sm:$0xff] }
  0x94   :  { %1236 = vmatprep.subr.bf16.mxu1 %v1472_v51 }
  0x95   :  { %1213 = vmatpush3.bf16.msra.mxu0 %v1212_v38 }
  0x96   :  { %1215 = vmatprep.subr.bf16.mxu0 %v1214_v39 }
  0x97   :  { %1238 = vmatpush3.bf16.msra.mxu1 %v1237_v42 }
  0x98   :  { %1239 = vmatprep.subr.bf16.mxu1 %v1472_v51 }
  0x99   :  { %1217 = vmatpush3.bf16.msra.mxu0 %v1216_v45 }
  0x9a   :  { %1242 = vmatprep.subr.bf16.mxu0 %v1472_v51 }
  0x9b   :  { %1241 = vmatpush3.bf16.msra.mxu1 %v1240_v46 }
  0x9c   :  { %1266 = vmatprep.subr.bf16.mxu1 %v1472_v51  ;;  %430 = vmatmul.mubr.f32.vlgmr.msra.gmra.mrb[2].mxu0 %v103_v47 }
  0x9d   :  { %1049 = vmatprep.mubr.msk.f32.mxu0 %vm1473_vm0, %v1474_v1  ;;  %1244 = vmatpush3.bf16.msra.mxu0 %v1243_v53  ;;  %v694_v53 = vld [vmem:[#allocation10] sm:$0xff] }
  0x9e   :  { %1015 = vmatmul.mubr.f32.vlgmr.msra.gmra.mrb[2].mxu1 %v105_v48  ;;  %1245 = vmatprep.subr.bf16.mxu0 %v1472_v51  ;;  %v1291_v56 = vpack.c.bf16 %v695_v54, %v694_v53 }
  0x9f   :  { %1084 = vmatprep.mubr.msk.f32.mxu1 %vm1473_vm0, %v1474_v1  ;;  %1268 = vmatpush3.bf16.msra.mxu1 %v1267_v14 }
  0xa0   :  { %1269 = vmatprep.subr.bf16.mxu1 %v1472_v51 }
  0xa1   :  { %1247 = vmatpush3.bf16.msra.mxu0 %v1246_v55  ;;  %v696_v55 = vld [vmem:[#allocation10 + $0x10] sm:$0xff] }
  0xa2   :  { %1248 = vmatprep.subr.bf16.mxu0 %v1472_v51 }
  0xa3   :  { %1271 = vmatpush3.bf16.msra.mxu1 %v1270_v16  ;;  %v709_v16 = vld [vmem:[#allocation10 + $0x78] sm:$0xff] }
  0xa4   :  { %1272 = vmatprep.subr.bf16.mxu1 %v1472_v51  ;;  %v1312_v17 = vpack.c.bf16 %v709_v16, %v708_v15 }
  0xa5   :  { %1250 = vmatpush3.bf16.msra.mxu0 %v1249_v58  ;;  %v1294_v58 = vpack.c.bf16 %v697_v57, %v696_v55 }
  0xa6   :  { %1251 = vmatprep.subr.bf16.mxu0 %v1472_v51 }
  0xa7   :  { %1274 = vmatpush3.bf16.msra.mxu1 %v1273_v19 }
  0xa8   :  { %1275 = vmatprep.subr.bf16.mxu1 %v1472_v51 }
  0xa9   :  { %1253 = vmatpush3.bf16.msra.mxu0 %v1252_v61  ;;  %v1297_v61 = vpack.c.bf16 %v699_v60, %v698_v59 }
  0xaa   :  { %1254 = vmatprep.subr.bf16.mxu0 %v1472_v51 }
  0xab   :  { %1277 = vmatpush3.bf16.msra.mxu1 %v1276_v22  ;;  %v808_v22 = vld [vmem:[%s1670_s8] ss:$0 sm:$0xff] }
  0xac   :  { %1278 = vmatprep.subr.bf16.mxu1 %v1472_v51 }
  0xad   :  { %1256 = vmatpush3.bf16.msra.mxu0 %v1255_v0  ;;  %v702_v0 = vld [vmem:[#allocation10 + $0x40] sm:$0xff] }
  0xae   :  { %1257 = vmatprep.subr.bf16.mxu0 %v1472_v51  ;;  %v1303_v3 = vpack.c.bf16 %v703_v2, %v702_v0 }
  0xaf   :  { %1280 = vmatpush3.bf16.msra.mxu1 %v1279_v25 }
  0xb0   :  { %1281 = vmatprep.subr.bf16.mxu1 %v1472_v51 }
  0xb1   :  { %1259 = vmatpush3.bf16.msra.mxu0 %v1258_v4  ;;  %v704_v4 = vld [vmem:[#allocation10 + $0x50] sm:$0xff] }
  0xb2   :  { %1260 = vmatprep.subr.bf16.mxu0 %v1472_v51  ;;  %v1306_v6 = vpack.c.bf16 %v705_v5, %v704_v4 }
  0xb3   :  { %1283 = vmatpush3.bf16.msra.mxu1 %v1282_v28 }
  0xb4   :  { %1284 = vmatprep.subr.bf16.mxu1 %v1472_v51 }
  0xb5   :  { %1262 = vmatpush3.bf16.msra.mxu0 %v1261_v7  ;;  %v706_v7 = vld [vmem:[#allocation10 + $0x60] sm:$0xff] }
  0xb6   :  { %1263 = vmatprep.subr.bf16.mxu0 %v1472_v51  ;;  %v1309_v9 = vpack.c.bf16 %v707_v8, %v706_v7 }
  0xb7   :  { %1286 = vmatpush3.bf16.msra.mxu1 %v1285_v31 }
  0xb8   :  { %1287 = vmatprep.subr.bf16.mxu1 %v1472_v51 }
  0xb9   :  { %1265 = vmatpush3.bf16.msra.mxu0 %v1264_v10  ;;  %v806_v10 = vld [vmem:[%s1666_s4] ss:$0 sm:$0xff] }
  0xba   :  { %1290 = vmatprep.subr.bf16.mxu0 %v1472_v51 }
  0xbb   :  { %1289 = vmatpush3.bf16.msra.mxu1 %v1288_v52 }
 0x14f   :  { %v841_v32 = vpop.f32.mrb[0].mxu0 }
 0x150   :  { %v842_v34 = vpop.f32.mrb[1].mxu0 }
 0x151   :  { %v876_v35 = vpop.f32.mrb[0].mxu1  ;;  %v843_v36 = vadd.f32 %v842_v34, %v841_v32 }
 0x152   :  { %v877_v37 = vpop.f32.mrb[1].mxu1 }
 0x153   :  { %v878_v38 = vadd.f32 %v877_v37, %v876_v35  ;;  %v292_v39 = vadd.f32 %v843_v36, %v805_v33 }
 0x155   :  { %v362_v40 = vadd.f32 %v878_v38, %v292_v39 }
 0x16f   :  { %v911_v41 = vpop.f32.mrb[2].mxu0 }
 0x170   :  { %v912_v42 = vpop.f32.mrb[3].mxu0 }
 0x171   :  { %v501_v43 = vpop.f32.mrb[2].mxu1  ;;  %v913_v44 = vadd.f32 %v912_v42, %v911_v41 }
 0x172   :  { %v1016_v45 = vpop.f32.mrb[3].mxu1 }
 0x173   :  { %v432_v46 = vadd.f32 %v913_v44, %v362_v40 }
 0x175   :  { %v502_v47 = vadd.f32 %v501_v43, %v432_v46 }
 0x177   :  { %v505_v48 = vmax.f32 %v502_v47, 0.0 }
 0x179   :  { %1050 = vmatmul.mubr.f32.vlgmr.msra.gmra.mrb[4].mxu0 %v505_v48 }
 0x17a   :  { %1119 = vmatprep.mubr.msk.f32.mxu0 %vm1473_vm0, %v1474_v1  ;;  %1292 = vmatpush3.bf16.msra.mxu0 %v1291_v56  ;;  %v700_v1 = vld [vmem:[#allocation10 + $0x30] sm:$0xff] }
 0x17b   :  { %1293 = vmatprep.subr.bf16.mxu0 %v1472_v51  ;;  %v1300_v63 = vpack.c.bf16 %v701_v62, %v700_v1 }
 0x17e   :  { %1295 = vmatpush3.bf16.msra.mxu0 %v1294_v58 }
 0x17f   :  { %1296 = vmatprep.subr.bf16.mxu0 %v1472_v51 }
 0x182   :  { %1298 = vmatpush3.bf16.msra.mxu0 %v1297_v61 }
 0x183   :  { %1299 = vmatprep.subr.bf16.mxu0 %v1472_v51 }
 0x186   :  { %1301 = vmatpush3.bf16.msra.mxu0 %v1300_v63 }
 0x187   :  { %1302 = vmatprep.subr.bf16.mxu0 %v1472_v51 }
 0x18a   :  { %1304 = vmatpush3.bf16.msra.mxu0 %v1303_v3 }
 0x18b   :  { %1305 = vmatprep.subr.bf16.mxu0 %v1472_v51 }
 0x18e   :  { %1307 = vmatpush3.bf16.msra.mxu0 %v1306_v6 }
 0x18f   :  { %1308 = vmatprep.subr.bf16.mxu0 %v1472_v51 }
 0x192   :  { %1310 = vmatpush3.bf16.msra.mxu0 %v1309_v9 }
 0x193   :  { %1311 = vmatprep.subr.bf16.mxu0 %v1472_v51 }
 0x196   :  { %1313 = vmatpush3.bf16.msra.mxu0 %v1312_v17 }
 0x24c   :  { %v595_v11 = vpop.f32.mrb[4].mxu0 }
 0x24d   :  { %v596_v12 = vadd.f32 %v806_v10, %v595_v11  ;;  %v1051_v13 = vpop.f32.mrb[5].mxu0 }
 0x24f   :  { %v599_v14 = vmax.f32 %v596_v12, 0.0 }
 0x251   :  { %1085 = vmatmul.mubr.f32.vlgmr.msra.gmra.mrb[4].mxu1 %v599_v14 }
 0x324   :  { %v689_v19 = vpop.f32.mrb[4].mxu1 }
 0x325   :  { %v690_v20 = vadd.f32 %v807_v18, %v689_v19  ;;  %v1086_v51 = vpop.f32.mrb[5].mxu1 }
 0x327   :  { %v693_v21 = vmax.f32 %v690_v20, 0.0 }
 0x329   :  { %1120 = vmatmul.mubr.f32.vlgmr.msra.gmra.mrb[6].mxu0 %v693_v21 }
 0x3fc   :  { %v783_v23 = vpop.f32.mrb[6].mxu0 }
 0x3fd   :  { %v784_v24 = vadd.f32 %v808_v22, %v783_v23  ;;  %v1121_v25 = vpop.f32.mrb[7].mxu0 }
 0x3ff   :  { %787 = vst [vmem:[#allocation11] sm:$0xff] %v784_v24 }
 0x400   :  { %1446 = shalt.err (!%p1443_p2)
}
 0x401   :  { %s1447_s10 = scalar_lea.hbm %s1671_s9, 128 }
 0x402   :  { %p1448_p3 = scmp.ne.s32.totalorder %s1671_s9, %s1447_s10  ;;  %p1451_p4 = scmp.lt.u32.totalorder %s1447_s10, %s1671_s9 }
 0x404   :  { %p1453_p5 = pnand %p1451_p4, %p1448_p3 }
 0x406   :  { %1456 = shalt.err (!%p1453_p5)
}
 0x407   :  { %797 = dma.vmem_to_hbm [thread:$0]  %s795_s12, 128, %s1671_s9, [#allocation4]  }
 0x408   :  { %1463 = dma.done.wait [#allocation4], 128  }
 0x409   :  { %1464 = vsyncadd [#allocation4], 4294967168 }
 0x40a   :  { %801 = vsyncpa [#allocation3], 1 }
 0x40b   :  { %802 = vsyncpa [#allocation6], 1 }
 0x40c   :  { %803 = vsyncpa [#allocation9], 1 }
 0x40d   :  { %804 = vsyncpa [#allocation4], 1 }

</bundles_post_ra>
